<compile_context>
chip_gen: v6e
topology: v6e:2x2x1
jax: 0.10.0
libtpu: 0.0.40
codegen_flags: <defaults>
</compile_context>

<pallas_src>
import functools
import math

import jax
import jax.numpy as jnp
from jax.experimental import pallas as pl
from jax.experimental.pallas import tpu as pltpu

LANE = 128          # lane (last-dim) width
SUB_GRANULE = 16    # bf16 packs 2 rows per sublane -> 16-row batch granule


def _round_up(x, m):
    return (x + m - 1) // m * m


def _pad_dim(d):
    """Feature-dim padding: 128 for tiny dims, multiples of 256 otherwise
    (v6e/v7x MXU is 2x256x256; identical to 128-rounding for power-of-two sizes)."""
    return LANE if d <= LANE else _round_up(d, 2 * LANE)


def _fused_mlp_kernel(x_ref, *refs, relu_flags, dout_true, compute_dtype):
    """Whole MLP in one kernel body.

    refs = (w0, b0, w1, b1, ..., o_ref).  Weights are VMEM-resident for every grid
    step; chained jnp.dot keeps activations on-chip (never round-trip HBM).
    """
    o_ref = refs[-1]
    wb = refs[:-1]
    num_layers = len(relu_flags)

    h = x_ref[...]                           # (TB, D0p) bf16 or f32 (cast below)
    for l in range(num_layers):
        w = wb[2 * l][...]                   # (Din_p, Dout_p), param dtype
        b = wb[2 * l + 1][...]               # (1, Dout_p), f32
        # MXU matmul in weight dtype, f32 accumulation; bias/ReLU stay f32 (VPU).
        y = jnp.dot(h.astype(w.dtype), w, preferred_element_type=jnp.float32)
        y = y + b
        if relu_flags[l]:
            y = jnp.maximum(y, 0.0)
        if l + 1 < num_layers:
            # Re-quantize to bf16 immediately: halves vreg/VMEM pressure; numerics
            # unchanged since the next consumer is the bf16 matmul anyway.
            h = y.astype(compute_dtype)
        else:
            h = y                            # keep final result f32 for the store
    # Store only the true output lanes (no 128x-padded f32 writeback for Dout=1).
    o_ref[...] = h[:, :dout_true].astype(o_ref.dtype)


def init_mlp_params(key, input_dim, embed_dims, output_layer=True):
    """Deterministic init mimicking torch.nn.Linear default U(-1/sqrt(fan_in), +).
    Weights stored pre-transposed as (in, out); bias as (out,)."""
    params = []
    d_in = input_dim
    layer_dims = list(embed_dims) + ([1] if output_layer else [])
    for d_out in layer_dims:
        key, kw, kb = jax.random.split(key, 3)
        bound = 1.0 / math.sqrt(d_in)
        w = jax.random.uniform(kw, (d_in, d_out), jnp.float32, -bound, bound)
        b = jax.random.uniform(kb, (d_out,), jnp.float32, -bound, bound)
        params.append((w, b))
        d_in = d_out
    return params


def prepare_params(params, param_dtype=jnp.bfloat16):
    """Zero-pad every layer to aligned (in_p, out_p); weights in param_dtype
    (bf16 -> 2x MXU rate & half the weight DMA on v6e/v7x), biases in f32.
    NOTE: activations are re-quantized to bf16 between layers (mirrored exactly in
    mlp_reference); deep stacks deviate slightly from a pure-f32 PyTorch MLP."""
    padded = []
    for w, b in params:
        din, dout = w.shape
        din_p, dout_p = _pad_dim(din), _pad_dim(dout)
        wp = jnp.zeros((din_p, dout_p), param_dtype).at[:din, :dout].set(
            w.astype(param_dtype))
        bp = jnp.zeros((1, dout_p), jnp.float32).at[:, :dout].set(
            b.reshape(1, -1).astype(jnp.float32))
        padded.append((wp, bp))
    return padded


def mlp_forward(x, params, output_layer=True, param_dtype=jnp.bfloat16,
                batch_tile=512):
    """x: (B, input_dim) f32 -> (B, Dout_last) f32 via one fused Pallas kernel."""
    B, Din = x.shape
    num_layers = len(params)
    relu_flags = tuple(not (output_layer and i == num_layers - 1)
                       for i in range(num_layers))
    dout_true = params[-1][0].shape[1]

    pparams = prepare_params(params, param_dtype)
    din_p = pparams[0][0].shape[0]

    # --- balanced batch tiling (no ~2x tail padding; >=2 tiles for v7x megacore) ---
    batch_tile = max(SUB_GRANULE, _round_up(batch_tile, SUB_GRANULE))
    n_tiles = pl.cdiv(B, batch_tile)
    if n_tiles == 1 and B > 2 * LANE:
        n_tiles = 2                                  # keep both v7x TensorCores busy
    tb = _round_up(pl.cdiv(B, n_tiles), SUB_GRANULE)
    bp = tb * pl.cdiv(B, tb)
    grid = (bp // tb,)

    # --- input: pad/cast only when actually required -------------------------------
    if bp != B or din_p != Din:
        xp = jnp.zeros((bp, din_p), param_dtype).at[:B, :Din].set(
            x.astype(param_dtype))
    else:
        xp = x       # f32 passthrough; cast fuses into the first in-kernel dot

    # --- specs ----------------------------------------------------------------------
    in_specs = [pl.BlockSpec((tb, din_p), lambda i: (i, 0))]
    flat_wb = []
    for wp, bpad in pparams:
        # Constant index_map + single buffer: DMA'd once, resident, no double-buffer.
        in_specs.append(pl.BlockSpec(wp.shape, lambda i: (0, 0),
                                     pipeline_mode=pl.Buffered(buffer_count=1)))
        in_specs.append(pl.BlockSpec(bpad.shape, lambda i: (0, 0),
                                     pipeline_mode=pl.Buffered(buffer_count=1)))
        flat_wb.extend([wp, bpad])

    # --- explicit VMEM budget: single-buffered weights + double-buffered tiles -------
    bytes_weights = sum(w.size * w.dtype.itemsize + b.size * b.dtype.itemsize
                        for w, b in pparams)
    max_dp = max(w.shape[1] for w, _ in pparams)
    bytes_x = 2 * tb * din_p * xp.dtype.itemsize          # double-buffered input tile
    bytes_out = 2 * tb * max(dout_true, LANE) * 4         # double-buffered output tile
    bytes_act = 2 * tb * max_dp * 4                       # live f32 + bf16 activations
    vmem_limit = int(1.5 * (bytes_weights + bytes_x + bytes_out + bytes_act)) + (2 << 20)
    vmem_limit = max(32 << 20, min(vmem_limit, 64 << 20))  # v7x physical VMEM = 64 MiB

    out = pl.pallas_call(
        functools.partial(_fused_mlp_kernel, relu_flags=relu_flags,
                          dout_true=dout_true, compute_dtype=param_dtype),
        out_shape=jax.ShapeDtypeStruct((bp, dout_true), jnp.float32),
        grid=grid,
        in_specs=in_specs,
        out_specs=pl.BlockSpec((tb, dout_true), lambda i: (i, 0)),
        compiler_params=pltpu.CompilerParams(
            dimension_semantics=("parallel",),
            vmem_limit_bytes=vmem_limit),
    )(xp, *flat_wb)

    # Slice away the batch padding outside the kernel (lane dim is already exact).
    return out[:B]


def mlp_reference(x, params, output_layer=True, param_dtype=jnp.bfloat16):
    """Pure-JAX reference mirroring the kernel's dtype policy exactly
    (bf16 matmul operands, f32 accumulation, f32 bias/ReLU)."""
    n = len(params)
    h = x
    for i, (w, b) in enumerate(params):
        y = jnp.dot(h.astype(param_dtype), w.astype(param_dtype),
                    preferred_element_type=jnp.float32)
        y = y + b.reshape(1, -1).astype(jnp.float32)
        if not (output_layer and i == n - 1):
            y = jnp.maximum(y, 0.0)
        h = y
    return h


if __name__ == "__main__":
    key = jax.random.PRNGKey(0)

    batch = 2
    input_dim = 32
    embed_dims = (64, 32)
    dropout = 0.0  # inference semantics; dropout is identity in the forward pass

    kx, kp = jax.random.split(key)
    x = jax.random.normal(kx, (batch, input_dim), dtype=jnp.float32)
    params = init_mlp_params(kp, input_dim, embed_dims, output_layer=True)

    out = mlp_forward(x, params, output_layer=True)
    out = jax.block_until_ready(out)

    ref = mlp_reference(x, params, output_layer=True)
    assert out.shape == (batch, 1), out.shape
    assert jnp.allclose(out, ref, atol=2e-3, rtol=2e-3), (out, ref)

    print("KERNEL_OK")
</pallas_src>

<mosaic_0001>
module attributes {stable_mosaic.version = 11 : i64} {
  func.func @_fused_mlp_kernel(%arg0: i32, %arg1: memref<16x128xbf16, #tpu.memory_space<vmem>>, %arg2: memref<128x128xbf16, #tpu.memory_space<vmem>>, %arg3: memref<1x128xf32, #tpu.memory_space<vmem>>, %arg4: memref<128x128xbf16, #tpu.memory_space<vmem>>, %arg5: memref<1x128xf32, #tpu.memory_space<vmem>>, %arg6: memref<128x128xbf16, #tpu.memory_space<vmem>>, %arg7: memref<1x128xf32, #tpu.memory_space<vmem>>, %arg8: memref<16x1xf32, #tpu.memory_space<vmem>>) attributes {dimension_semantics = [#tpu.dimension_semantics<parallel>], iteration_bounds = array<i64: 1>, scalar_prefetch = 0 : i64, scratch_operands = 0 : i64, tpu.core_type = #tpu.core_type<tc>, window_params = [{transform_indices = @transform_0, window_bounds = array<i64: 16, 128>}, {pipeline_mode = #tpu.pipeline_mode<synchronous>, transform_indices = @transform_1, window_bounds = array<i64: 128, 128>}, {pipeline_mode = #tpu.pipeline_mode<synchronous>, transform_indices = @transform_2, window_bounds = array<i64: 1, 128>}, {pipeline_mode = #tpu.pipeline_mode<synchronous>, transform_indices = @transform_3, window_bounds = array<i64: 128, 128>}, {pipeline_mode = #tpu.pipeline_mode<synchronous>, transform_indices = @transform_4, window_bounds = array<i64: 1, 128>}, {pipeline_mode = #tpu.pipeline_mode<synchronous>, transform_indices = @transform_5, window_bounds = array<i64: 128, 128>}, {pipeline_mode = #tpu.pipeline_mode<synchronous>, transform_indices = @transform_6, window_bounds = array<i64: 1, 128>}, {transform_indices = @transform_7, window_bounds = array<i64: 16, 1>}]} {
    %c0 = arith.constant 0 : index
    %c0_0 = arith.constant 0 : index
    %0 = vector.load %arg1[%c0, %c0_0] : memref<16x128xbf16, #tpu.memory_space<vmem>>, vector<16x128xbf16>
    %c0_1 = arith.constant 0 : index
    %c0_2 = arith.constant 0 : index
    %1 = vector.load %arg2[%c0_1, %c0_2] : memref<128x128xbf16, #tpu.memory_space<vmem>>, vector<128x128xbf16>
    %c0_3 = arith.constant 0 : index
    %c0_4 = arith.constant 0 : index
    %2 = vector.load %arg3[%c0_3, %c0_4] : memref<1x128xf32, #tpu.memory_space<vmem>>, vector<1x128xf32>
    %cst = arith.constant dense<0.000000e+00> : vector<16x128xf32>
    %3 = tpu.matmul %0, %1, %cst {dimension_numbers = #tpu.dot_dimension_numbers<[1], [0], [0], [1], [0, 0, 1, 1], [], []>} : vector<16x128xbf16>, vector<128x128xbf16>, vector<16x128xf32> -> vector<16x128xf32>
    %4 = vector.broadcast %2 : vector<1x128xf32> to vector<16x128xf32>
    %5 = arith.addf %3, %4 : vector<16x128xf32>
    %cst_5 = arith.constant 0.000000e+00 : f32
    %6 = vector.broadcast %cst_5 : f32 to vector<16x128xf32>
    %7 = arith.maximumf %5, %6 : vector<16x128xf32>
    %8 = arith.truncf %7 : vector<16x128xf32> to vector<16x128xbf16>
    %c0_6 = arith.constant 0 : index
    %c0_7 = arith.constant 0 : index
    %9 = vector.load %arg4[%c0_6, %c0_7] : memref<128x128xbf16, #tpu.memory_space<vmem>>, vector<128x128xbf16>
    %c0_8 = arith.constant 0 : index
    %c0_9 = arith.constant 0 : index
    %10 = vector.load %arg5[%c0_8, %c0_9] : memref<1x128xf32, #tpu.memory_space<vmem>>, vector<1x128xf32>
    %cst_10 = arith.constant dense<0.000000e+00> : vector<16x128xf32>
    %11 = tpu.matmul %8, %9, %cst_10 {dimension_numbers = #tpu.dot_dimension_numbers<[1], [0], [0], [1], [0, 0, 1, 1], [], []>} : vector<16x128xbf16>, vector<128x128xbf16>, vector<16x128xf32> -> vector<16x128xf32>
    %12 = vector.broadcast %10 : vector<1x128xf32> to vector<16x128xf32>
    %13 = arith.addf %11, %12 : vector<16x128xf32>
    %cst_11 = arith.constant 0.000000e+00 : f32
    %14 = vector.broadcast %cst_11 : f32 to vector<16x128xf32>
    %15 = arith.maximumf %13, %14 : vector<16x128xf32>
    %16 = arith.truncf %15 : vector<16x128xf32> to vector<16x128xbf16>
    %c0_12 = arith.constant 0 : index
    %c0_13 = arith.constant 0 : index
    %17 = vector.load %arg6[%c0_12, %c0_13] : memref<128x128xbf16, #tpu.memory_space<vmem>>, vector<128x128xbf16>
    %c0_14 = arith.constant 0 : index
    %c0_15 = arith.constant 0 : index
    %18 = vector.load %arg7[%c0_14, %c0_15] : memref<1x128xf32, #tpu.memory_space<vmem>>, vector<1x128xf32>
    %cst_16 = arith.constant dense<0.000000e+00> : vector<16x128xf32>
    %19 = tpu.matmul %16, %17, %cst_16 {dimension_numbers = #tpu.dot_dimension_numbers<[1], [0], [0], [1], [0, 0, 1, 1], [], []>} : vector<16x128xbf16>, vector<128x128xbf16>, vector<16x128xf32> -> vector<16x128xf32>
    %20 = vector.broadcast %18 : vector<1x128xf32> to vector<16x128xf32>
    %21 = arith.addf %19, %20 : vector<16x128xf32>
    %22 = vector.extract_strided_slice %21 {offsets = [0, 0], sizes = [16, 1], strides = [1, 1]} : vector<16x128xf32> to vector<16x1xf32>
    %c0_17 = arith.constant 0 : index
    %c0_18 = arith.constant 0 : index
    %23 = vector.load %arg8[%c0_17, %c0_18] : memref<16x1xf32, #tpu.memory_space<vmem>>, vector<16x1xf32>
    tpu.vector_store %arg8[%c0_17, %c0_18], %22 {strides = array<i32>} : memref<16x1xf32, #tpu.memory_space<vmem>>, vector<16x1xf32>,
    return
  }
  func.func @transform_0(%arg0: i32) -> (i32, i32) {
    %c0_i32 = arith.constant 0 : i32
    %c0_i32_0 = arith.constant 0 : i32
    return %arg0, %c0_i32 : i32, i32
  }
  func.func @transform_1(%arg0: i32) -> (i32, i32) {
    %c0_i32 = arith.constant 0 : i32
    %c0_i32_0 = arith.constant 0 : i32
    %c0_i32_1 = arith.constant 0 : i32
    return %c0_i32, %c0_i32_0 : i32, i32
  }
  func.func @transform_2(%arg0: i32) -> (i32, i32) {
    %c0_i32 = arith.constant 0 : i32
    %c0_i32_0 = arith.constant 0 : i32
    %c0_i32_1 = arith.constant 0 : i32
    return %c0_i32, %c0_i32_0 : i32, i32
  }
  func.func @transform_3(%arg0: i32) -> (i32, i32) {
    %c0_i32 = arith.constant 0 : i32
    %c0_i32_0 = arith.constant 0 : i32
    %c0_i32_1 = arith.constant 0 : i32
    return %c0_i32, %c0_i32_0 : i32, i32
  }
  func.func @transform_4(%arg0: i32) -> (i32, i32) {
    %c0_i32 = arith.constant 0 : i32
    %c0_i32_0 = arith.constant 0 : i32
    %c0_i32_1 = arith.constant 0 : i32
    return %c0_i32, %c0_i32_0 : i32, i32
  }
  func.func @transform_5(%arg0: i32) -> (i32, i32) {
    %c0_i32 = arith.constant 0 : i32
    %c0_i32_0 = arith.constant 0 : i32
    %c0_i32_1 = arith.constant 0 : i32
    return %c0_i32, %c0_i32_0 : i32, i32
  }
  func.func @transform_6(%arg0: i32) -> (i32, i32) {
    %c0_i32 = arith.constant 0 : i32
    %c0_i32_0 = arith.constant 0 : i32
    %c0_i32_1 = arith.constant 0 : i32
    return %c0_i32, %c0_i32_0 : i32, i32
  }
  func.func @transform_7(%arg0: i32) -> (i32, i32) {
    %c0_i32 = arith.constant 0 : i32
    %c0_i32_0 = arith.constant 0 : i32
    return %arg0, %c0_i32 : i32, i32
  }
}

</mosaic_0001>

<bundles_post_ra>
// kernel: tpu_custom_call.1
= control target key start
LH: loop header
LB: loop body
LE: loop exit
PB: predicated region body
PF: predicated region fallthrough
CT: control target
= control target key end

     0   :  { %12 = vsyncpa [#allocation3], 0  ;;  %s793_s0 = inlined_call_operand.hbm [shape: bf16[16,128], index: 0, kind: input, shape index: {}]   ;;  %s794_s1 = inlined_call_operand.hbm [shape: bf16[128,128], index: 1, kind: input, shape index: {}]   ;;  %s795_s2 = inlined_call_operand.vmem [shape: f32[1,128], index: 2, kind: input, shape index: {}]   ;;  %s796_s3 = inlined_call_operand.hbm [shape: bf16[128,128], index: 3, kind: input, shape index: {}]   ;;  %s797_s4 = inlined_call_operand.vmem [shape: f32[1,128], index: 4, kind: input, shape index: {}]   ;;  %s798_s5 = inlined_call_operand.hbm [shape: bf16[128,128], index: 5, kind: input, shape index: {}]   ;;  %s799_s6 = inlined_call_operand.vmem [shape: f32[1,128], index: 6, kind: input, shape index: {}]   ;;  %s800_s7 = inlined_call_operand.vmem [shape: f32[16,1], index: 7, kind: output, shape index: {}]  }
   0x1   :  { %13 = vsyncpa [#allocation5], 0 }
   0x2   :  { %14 = vsyncpa [#allocation8], 0  ;;  %s676_s24 = smov [#allocation4]   ;;  %s677_s26 = smov [#allocation2]  }
   0x3   :  { %s32_s25 = sshll.u32 %s676_s24, 4  ;;  %s20_s27 = sshll.u32 %s677_s26, 4  ;;  %s33_s25 = int_to_ptr.vmem [resolvable:$true] %s32_s25  ;;  %s21_s27 = int_to_ptr.vmem [resolvable:$true] %s20_s27 }
   0x4   :  { %s598_s28 = scalar_lea.vmem %s33_s25, 1024  ;;  %p603_p1 = scmp.lt.s32.totalorder %s33_s25, %s33_s25 }
   0x5   :  { %p599_p0 = scmp.ne.s32.totalorder %s33_s25, %s598_s28  ;;  %p604_p2 = scmp.lt.s32.totalorder %s598_s28, %s598_s28 }
   0x7   :  { %p605_p3 = por %p604_p2, %p603_p1 }
   0x9   :  { %p606_p4 = pnand %p605_p3, %p599_p0 }
   0xb   :  { %609 = shalt.err (!%p606_p4)
}
   0xc   :  { %s678_s29 = smov 64   ;;  %s679_s30 = smov 4  }
   0xd   :  { %38 = dma.hbm_to_vmem [thread:$0]  %s794_s1, 1024, %s33_s25, [#allocation5], %s678_s29, %s678_s29, %s679_s30  }
   0xe   :  { %s618_s10 = scalar_lea.vmem %s21_s27, 128  ;;  %p623_p6 = scmp.lt.s32.totalorder %s21_s27, %s21_s27 }
   0xf   :  { %p619_p5 = scmp.ne.s32.totalorder %s21_s27, %s618_s10  ;;  %p624_p7 = scmp.lt.s32.totalorder %s618_s10, %s618_s10 }
  0x11   :  { %p625_p8 = por %p624_p7, %p623_p6 }
  0x13   :  { %p626_p9 = pnand %p625_p8, %p619_p5 }
  0x15   :  { %629 = shalt.err (!%p626_p9)
}
  0x16   :  { %26 = dma.hbm_to_vmem [thread:$0]  %s793_s0, 128, %s21_s27, [#allocation3], %s678_s29, %s678_s29, %s679_s30  }
  0x17   :  { %s680_s13 = smov [#allocation6]   ;;  %s681_s15 = smov [#allocation7]  }
  0x18   :  { %s46_s14 = sshll.u32 %s680_s13, 4  ;;  %s60_s16 = sshll.u32 %s681_s15, 4  ;;  %s47_s14 = int_to_ptr.vmem [resolvable:$true] %s46_s14  ;;  %s61_s16 = int_to_ptr.vmem [resolvable:$true] %s60_s16 }
  0x19   :  { %s638_s1 = scalar_lea.vmem %s47_s14, 1024  ;;  %p643_p11 = scmp.lt.s32.totalorder %s47_s14, %s47_s14 }
  0x1a   :  { %p639_p10 = scmp.ne.s32.totalorder %s47_s14, %s638_s1  ;;  %p644_p12 = scmp.lt.s32.totalorder %s638_s1, %s638_s1 }
  0x1c   :  { %p645_p13 = por %p644_p12, %p643_p11 }
  0x1e   :  { %p646_p0 = pnand %p645_p13, %p639_p10 }
  0x20   :  { %649 = shalt.err (!%p646_p0)
}
  0x21   :  { %52 = dma.hbm_to_vmem [thread:$0]  %s796_s3, 1024, %s47_s14, [#allocation5], %s678_s29, %s678_s29, %s679_s30  }
  0x22   :  { %s658_s0 = scalar_lea.vmem %s61_s16, 1024  ;;  %p663_p2 = scmp.lt.s32.totalorder %s61_s16, %s61_s16 }
  0x23   :  { %p659_p1 = scmp.ne.s32.totalorder %s61_s16, %s658_s0  ;;  %p664_p3 = scmp.lt.s32.totalorder %s658_s0, %s658_s0 }
  0x25   :  { %p665_p4 = por %p664_p3, %p663_p2 }
  0x27   :  { %p666_p5 = pnand %p665_p4, %p659_p1 }
  0x29   :  { %669 = shalt.err (!%p666_p5)
}
  0x2a   :  { %66 = dma.hbm_to_vmem [thread:$0]  %s798_s5, 1024, %s61_s16, [#allocation8], %s678_s29, %s678_s29, %s679_s30  }
  0x2b   :  { %670 = dma.done.wait [#allocation3], 128  }
  0x2c   :  { %671 = vsyncadd [#allocation3], 4294967168 }
  0x2d   :  { %672 = dma.done.wait [#allocation5], 2048  }
  0x2e   :  { %673 = vsyncadd [#allocation5], 4294965248 }
  0x2f   :  { %674 = dma.done.wait [#allocation8], 1024  }
  0x30   :  { %675 = vsyncadd [#allocation8], 4294966272  ;;  %v682_v0 = vmov 0.0   ;;  %vm683_vm0 = vmmov 0   ;;  %v565_v1 = vld [vmem:[#allocation4 + $0x38] sm:$0xff]   ;;  %v566_v2 = vld [vmem:[#allocation4 + $0x30] sm:$0xff]  }
  0x31   :  { %497 = vmatprep.subr.bf16.mxu0 %v682_v0  ;;  %513 = vmatprep.mubr.msk.bf16.mxu0 %vm683_vm0, %v682_v0  ;;  %v567_v3 = vld [vmem:[#allocation4 + $0x28] sm:$0xff]   ;;  %v574_v4 = vld [vmem:[#allocation6 + $0x38] sm:$0xff]   ;;  %v568_v5 = vld [vmem:[#allocation4 + $0x20] sm:$0xff]   ;;  %vm432_vm1 = vcmask 7168  }
  0x32   :  { %517 = vmatprep.subr.bf16.mxu1 %v682_v0  ;;  %533 = vmatprep.mubr.msk.bf16.mxu1 %vm683_vm0, %v682_v0  ;;  %v575_v6 = vld [vmem:[#allocation6 + $0x30] sm:$0xff]   ;;  %v569_v7 = vld [vmem:[#allocation4 + $0x18] sm:$0xff]   ;;  %v576_v8 = vld [vmem:[#allocation6 + $0x28] sm:$0xff]  }
  0x33   :  { %498 = vmatpush3.bf16.msra.mxu0 %v565_v1  ;;  %518 = vmatpush3.bf16.msra.mxu1 %v574_v4  ;;  %v570_v9 = vld [vmem:[#allocation4 + $0x10] sm:$0xff]   ;;  %v577_v10 = vld [vmem:[#allocation6 + $0x20] sm:$0xff]   ;;  %v571_v11 = vld [vmem:[#allocation4 + $0x8] sm:$0xff]  }
  0x34   :  { %499 = vmatprep.subr.bf16.mxu0 %v682_v0  ;;  %519 = vmatprep.subr.bf16.mxu1 %v682_v0  ;;  %v578_v12 = vld [vmem:[#allocation6 + $0x18] sm:$0xff]   ;;  %v572_v13 = vld [vmem:[#allocation4] sm:$0xff]   ;;  %v579_v15 = vld [vmem:[#allocation6 + $0x10] sm:$0xff]  }
  0x35   :  { %v573_v14 = vld [vmem:[#allocation2] sm:$0xff]   ;;  %v580_v16 = vld [vmem:[#allocation6 + $0x8] sm:$0xff]   ;;  %v581_v17 = vld [vmem:[#allocation6] sm:$0xff]  }
  0x36   :  { %v582_v18 = vld [vmem:[#allocation7 + $0x38] sm:$0xff]   ;;  %v583_v19 = vld [vmem:[#allocation7 + $0x30] sm:$0xff]   ;;  %v584_v20 = vld [vmem:[#allocation7 + $0x28] sm:$0xff]  }
  0x37   :  { %500 = vmatpush3.bf16.msra.mxu0 %v566_v2  ;;  %520 = vmatpush3.bf16.msra.mxu1 %v575_v6  ;;  %v585_v21 = vld [vmem:[#allocation7 + $0x20] sm:$0xff]   ;;  %v586_v22 = vld [vmem:[#allocation7 + $0x18] sm:$0xff]   ;;  %v587_v33 = vld [vmem:[#allocation7 + $0x10] sm:$0xff]  }
  0x38   :  { %501 = vmatprep.subr.bf16.mxu0 %v682_v0  ;;  %521 = vmatprep.subr.bf16.mxu1 %v682_v0  ;;  %v442_v23 = vld [vmem:[%s795_s2] ss:$0 sm:$0xff]  ;;  %v588_v34 = vld [vmem:[#allocation7 + $0x8] sm:$0xff]   ;;  %v589_v35 = vld [vmem:[#allocation7] sm:$0xff]  }
  0x39   :  { %v452_v36 = vld [vmem:[%s797_s4] ss:$0 sm:$0xff] }
  0x3a   :  { %v461_v46 = vld [vmem:[%s799_s6] ss:$0 sm:$0xff] }
  0x3b   :  { %502 = vmatpush3.bf16.msra.mxu0 %v567_v3  ;;  %522 = vmatpush3.bf16.msra.mxu1 %v576_v8 }
  0x3c   :  { %503 = vmatprep.subr.bf16.mxu0 %v682_v0  ;;  %523 = vmatprep.subr.bf16.mxu1 %v682_v0 }
  0x3f   :  { %504 = vmatpush3.bf16.msra.mxu0 %v568_v5  ;;  %524 = vmatpush3.bf16.msra.mxu1 %v577_v10 }
  0x40   :  { %505 = vmatprep.subr.bf16.mxu0 %v682_v0  ;;  %525 = vmatprep.subr.bf16.mxu1 %v682_v0 }
  0x43   :  { %506 = vmatpush3.bf16.msra.mxu0 %v569_v7  ;;  %526 = vmatpush3.bf16.msra.mxu1 %v578_v12 }
  0x44   :  { %507 = vmatprep.subr.bf16.mxu0 %v682_v0  ;;  %527 = vmatprep.subr.bf16.mxu1 %v682_v0 }
  0x47   :  { %508 = vmatpush3.bf16.msra.mxu0 %v570_v9  ;;  %528 = vmatpush3.bf16.msra.mxu1 %v579_v15 }
  0x48   :  { %509 = vmatprep.subr.bf16.mxu0 %v682_v0  ;;  %529 = vmatprep.subr.bf16.mxu1 %v682_v0 }
  0x4b   :  { %510 = vmatpush3.bf16.msra.mxu0 %v571_v11  ;;  %530 = vmatpush3.bf16.msra.mxu1 %v580_v16 }
  0x4c   :  { %511 = vmatprep.subr.bf16.mxu0 %v682_v0  ;;  %531 = vmatprep.subr.bf16.mxu1 %v682_v0 }
  0x4f   :  { %512 = vmatpush3.bf16.msra.mxu0 %v572_v13  ;;  %532 = vmatpush3.bf16.msra.mxu1 %v581_v17 }
  0x50   :  { %537 = vmatprep.subr.bf16.mxu0 %v682_v0 }
  0x52   :  { %514 = vmatmul.mubr.bf16.vlgmr.msra.gmra.mxu0 %v573_v14 }
  0x53   :  { %553 = vmatprep.mubr.msk.bf16.mxu0 %vm683_vm0, %v682_v0  ;;  %538 = vmatpush3.bf16.msra.mxu0 %v582_v18 }
  0x54   :  { %539 = vmatprep.subr.bf16.mxu0 %v682_v0 }
  0x57   :  { %540 = vmatpush3.bf16.msra.mxu0 %v583_v19 }
  0x58   :  { %541 = vmatprep.subr.bf16.mxu0 %v682_v0 }
  0x5b   :  { %542 = vmatpush3.bf16.msra.mxu0 %v584_v20 }
  0x5c   :  { %543 = vmatprep.subr.bf16.mxu0 %v682_v0 }
  0x5f   :  { %544 = vmatpush3.bf16.msra.mxu0 %v585_v21 }
  0x60   :  { %545 = vmatprep.subr.bf16.mxu0 %v682_v0 }
  0x63   :  { %546 = vmatpush3.bf16.msra.mxu0 %v586_v22 }
  0x64   :  { %547 = vmatprep.subr.bf16.mxu0 %v682_v0 }
  0x67   :  { %548 = vmatpush3.bf16.msra.mxu0 %v587_v33 }
  0x68   :  { %549 = vmatprep.subr.bf16.mxu0 %v682_v0 }
  0x6b   :  { %550 = vmatpush3.bf16.msra.mxu0 %v588_v34 }
  0x6c   :  { %551 = vmatprep.subr.bf16.mxu0 %v682_v0 }
  0x6f   :  { %552 = vmatpush3.bf16.msra.mxu0 %v589_v35 }
 0x112   :  { %v195_v24 = vpop.f32.mrf.mxu0 }
 0x113   :  { %v196_v26 = vadd.f32 %v442_v23, %v195_v24 }
 0x114   :  { %v515_v25 = vpop.f32.mrf.mxu0 }
 0x115   :  { %v202_v30 = vmax.f32 %v196_v26, 0.0 }
 0x116   :  { %v198_v27 = vpop.f32.mrf.mxu0 }
 0x117   :  { %v199_v28 = vadd.f32 %v442_v23, %v198_v27 }
 0x118   :  { %v516_v29 = vpop.f32.mrf.mxu0 }
 0x119   :  { %v203_v31 = vmax.f32 %v199_v28, 0.0 }
 0x11b   :  { %v204_v32 = vpack.c.bf16 %v203_v31, %v202_v30 }
 0x11d   :  { %534 = vmatmul.mubr.bf16.vlgmr.msra.gmra.mxu1 %v204_v32 }
 0x1dd   :  { %v310_v37 = vpop.f32.mrf.mxu1 }
 0x1de   :  { %v311_v39 = vadd.f32 %v452_v36, %v310_v37 }
 0x1df   :  { %v535_v38 = vpop.f32.mrf.mxu1 }
 0x1e0   :  { %v317_v43 = vmax.f32 %v311_v39, 0.0 }
 0x1e1   :  { %v313_v40 = vpop.f32.mrf.mxu1 }
 0x1e2   :  { %v314_v41 = vadd.f32 %v452_v36, %v313_v40 }
 0x1e3   :  { %v536_v42 = vpop.f32.mrf.mxu1 }
 0x1e4   :  { %v318_v44 = vmax.f32 %v314_v41, 0.0 }
 0x1e6   :  { %v319_v45 = vpack.c.bf16 %v318_v44, %v317_v43 }
 0x1e8   :  { %554 = vmatmul.mubr.bf16.vlgmr.msra.gmra.mxu0 %v319_v45 }
 0x2a8   :  { %v425_v47 = vpop.f32.mrf.mxu0 }
 0x2a9   :  { %v426_v48 = vadd.f32 %v461_v46, %v425_v47 }
 0x2aa   :  { %v555_v49 = vpop.f32.mrf.mxu0 }
 0x2ab   :  { %433 = vst.msk [vmem:[%s800_s7] sm:$0xff] %vm432_vm1, %v426_v48 }
 0x2ac   :  { %v428_v50 = vpop.f32.mrf.mxu0 }
 0x2ad   :  { %v429_v51 = vadd.f32 %v461_v46, %v428_v50 }
 0x2ae   :  { %v556_v52 = vpop.f32.mrf.mxu0 }
 0x2af   :  { %434 = vst.msk [vmem:[%s800_s7 + $0x8] sm:$0xff] %vm432_vm1, %v429_v51 }
 0x2b0   :  { %439 = vsyncpa [#allocation3], 1 }
 0x2b1   :  { %440 = vsyncpa [#allocation5], 1 }
 0x2b2   :  { %441 = vsyncpa [#allocation8], 1 }

</bundles_post_ra>
